<compile_context>
chip_gen: v5e
topology: v5e:2x2
jax: 0.10.0
libtpu: 0.0.40
codegen_flags: <defaults>
</compile_context>

<pallas_src>
import functools

import jax
import jax.numpy as jnp
from jax.experimental import pallas as pl
from jax.experimental.pallas import tpu as pltpu

IN_FEATURES = 244
OUT_FEATURES = 64
LN_EPS = 1e-5
MAX_TB = 1024  # batch tile (rows); multiple of 8, sized for v7x VMEM budget


def _libs_kernel(x_ref, w_ref, b_ref, o_ref):
    # x_ref: (TB, 244)  input spectra tile
    # w_ref: (244, 64)  folded weight  (gamma[:,None] * W^T)
    # b_ref: (1, 64)    folded bias    (beta @ W^T + b)
    # o_ref: (TB, 64)   output tile
    x = x_ref[...].astype(jnp.float32)

    # LayerNorm statistics over the last dim (biased variance, torch semantics).
    mean = jnp.mean(x, axis=-1, keepdims=True)
    centered = x - mean
    var = jnp.mean(centered * centered, axis=-1, keepdims=True)
    xn = centered * jax.lax.rsqrt(var + LN_EPS)

    # Affine is folded into w/b, so: ReLU(xn @ W' + b')  (MXU, f32 accumulate)
    out = jnp.dot(xn, w_ref[...], preferred_element_type=jnp.float32)
    out = out + b_ref[...]
    o_ref[...] = jnp.maximum(out, 0.0).astype(o_ref.dtype)


def prepare_libs_params(gamma, beta, weight, bias):
    """One-time host-side parameter prep (fold LayerNorm affine into Linear).

    gamma, beta: (244,)   LayerNorm weight / bias
    weight:      (64, 244) Linear weight (PyTorch layout)
    bias:        (64,)     Linear bias
    Returns (w_folded (244, 64), b_folded (1, 64)).
    """
    w_t = weight.T.astype(jnp.float32)                       # (244, 64)
    w_folded = gamma.astype(jnp.float32)[:, None] * w_t      # (244, 64)
    b_folded = (beta.astype(jnp.float32) @ w_t
                + bias.astype(jnp.float32)).reshape(1, OUT_FEATURES)
    return w_folded, b_folded


@functools.partial(jax.jit, static_argnames=("block_rows",))
def libs_feature_extractor(x, w_folded, b_folded, *, block_rows=MAX_TB):
    """x: (B, 244) f32; w_folded: (244, 64); b_folded: (1, 64) -> (B, 64)."""
    B, F = x.shape
    assert F == IN_FEATURES

    # Batch tile: full batch if small, otherwise MAX_TB (multiple of 8).
    tb = B if B <= block_rows else block_rows
    grid = (pl.cdiv(B, tb),)

    return pl.pallas_call(
        _libs_kernel,
        out_shape=jax.ShapeDtypeStruct((B, OUT_FEATURES), jnp.float32),
        grid_spec=pltpu.PrefetchScalarGridSpec(
            num_scalar_prefetch=0,
            grid=grid,
            in_specs=[
                pl.BlockSpec((tb, F), lambda i: (i, 0)),
                pl.BlockSpec((F, OUT_FEATURES), lambda i: (0, 0)),
                pl.BlockSpec((1, OUT_FEATURES), lambda i: (0, 0)),
            ],
            out_specs=pl.BlockSpec((tb, OUT_FEATURES), lambda i: (i, 0)),
        ),
        compiler_params=pltpu.CompilerParams(
            # Batch axis is fully independent: allow megacore sharding (v7x).
            dimension_semantics=("parallel",)),
    )(x, w_folded, b_folded)


def _reference(x, gamma, beta, weight, bias):
    mean = jnp.mean(x, axis=-1, keepdims=True)
    var = jnp.mean((x - mean) ** 2, axis=-1, keepdims=True)
    xn = (x - mean) / jnp.sqrt(var + LN_EPS)
    y = xn * gamma + beta
    out = y @ weight.T + bias
    return jnp.maximum(out, 0.0)


if __name__ == "__main__":
    key = jax.random.PRNGKey(0)
    k_x, k_g, k_be, k_w, k_b, k_x2 = jax.random.split(key, 6)

    # Small test batch, consistent with the module's (B, 244) input.
    B = 8
    x = jax.random.normal(k_x, (B, IN_FEATURES), dtype=jnp.float32)

    # Non-trivial gamma/beta to exercise the affine folding.
    gamma = 1.0 + 0.1 * jax.random.normal(k_g, (IN_FEATURES,), jnp.float32)
    beta = 0.1 * jax.random.normal(k_be, (IN_FEATURES,), jnp.float32)
    bound = 1.0 / jnp.sqrt(jnp.float32(IN_FEATURES))
    weight = jax.random.uniform(
        k_w, (OUT_FEATURES, IN_FEATURES), jnp.float32, -bound, bound)
    bias = jax.random.uniform(
        k_b, (OUT_FEATURES,), jnp.float32, -bound, bound)

    # One-time parameter prep (hoisted out of the hot path).
    w_folded, b_folded = prepare_libs_params(gamma, beta, weight, bias)

    out = libs_feature_extractor(x, w_folded, b_folded)
    out = jax.block_until_ready(out)
    ref = _reference(x, gamma, beta, weight, bias)
    assert out.shape == (B, OUT_FEATURES)
    assert jnp.allclose(out, ref, atol=1e-4, rtol=1e-4), "mismatch (small B)"

    # Exercise the tiled path (multiple grid steps + a partial tail tile).
    B2 = MAX_TB + 72   # not a multiple of the tile -> checks tail padding
    x2 = jax.random.normal(k_x2, (B2, IN_FEATURES), dtype=jnp.float32)
    out2 = jax.block_until_ready(
        libs_feature_extractor(x2, w_folded, b_folded))
    ref2 = _reference(x2, gamma, beta, weight, bias)
    assert out2.shape == (B2, OUT_FEATURES)
    assert jnp.allclose(out2, ref2, atol=1e-4, rtol=1e-4), "mismatch (tiled)"

    print("KERNEL_OK")
</pallas_src>

<mosaic_0001>
module attributes {stable_mosaic.version = 11 : i64} {
  func.func @_libs_kernel(%arg0: i32, %arg1: memref<8x244xf32, #tpu.memory_space<vmem>>, %arg2: memref<244x64xf32, #tpu.memory_space<vmem>>, %arg3: memref<1x64xf32, #tpu.memory_space<vmem>>, %arg4: memref<8x64xf32, #tpu.memory_space<vmem>>) attributes {dimension_semantics = [#tpu.dimension_semantics<parallel>], iteration_bounds = array<i64: 1>, scalar_prefetch = 0 : i64, scratch_operands = 0 : i64, tpu.core_type = #tpu.core_type<tc>, window_params = [{transform_indices = @transform_0, window_bounds = array<i64: 8, 244>}, {pipeline_mode = #tpu.pipeline_mode<synchronous>, transform_indices = @transform_1, window_bounds = array<i64: 244, 64>}, {pipeline_mode = #tpu.pipeline_mode<synchronous>, transform_indices = @transform_2, window_bounds = array<i64: 1, 64>}, {transform_indices = @transform_3, window_bounds = array<i64: 8, 64>}]} {
    %c0 = arith.constant 0 : index
    %c0_0 = arith.constant 0 : index
    %0 = vector.load %arg1[%c0, %c0_0] : memref<8x244xf32, #tpu.memory_space<vmem>>, vector<8x244xf32>
    %cst = arith.constant dense<0.000000e+00> : vector<8xf32>
    %1 = vector.multi_reduction <add>, %0, %cst [1] : vector<8x244xf32> to vector<8xf32>
    %2 = vector.shape_cast %1 : vector<8xf32> to vector<8x1xf32>
    %cst_1 = arith.constant 2.440000e+02 : f32
    %3 = vector.broadcast %cst_1 : f32 to vector<8x1xf32>
    %4 = arith.divf %2, %3 : vector<8x1xf32>
    %5 = vector.broadcast %4 : vector<8x1xf32> to vector<8x244xf32>
    %6 = arith.subf %0, %5 : vector<8x244xf32>
    %7 = arith.mulf %6, %6 : vector<8x244xf32>
    %cst_2 = arith.constant dense<0.000000e+00> : vector<8xf32>
    %8 = vector.multi_reduction <add>, %7, %cst_2 [1] : vector<8x244xf32> to vector<8xf32>
    %9 = vector.shape_cast %8 : vector<8xf32> to vector<8x1xf32>
    %cst_3 = arith.constant 2.440000e+02 : f32
    %10 = vector.broadcast %cst_3 : f32 to vector<8x1xf32>
    %11 = arith.divf %9, %10 : vector<8x1xf32>
    %cst_4 = arith.constant 9.99999974E-6 : f32
    %12 = vector.broadcast %cst_4 : f32 to vector<8x1xf32>
    %13 = arith.addf %11, %12 : vector<8x1xf32>
    %14 = math.rsqrt %13 : vector<8x1xf32>
    %15 = vector.broadcast %14 : vector<8x1xf32> to vector<8x244xf32>
    %16 = arith.mulf %6, %15 : vector<8x244xf32>
    %c0_5 = arith.constant 0 : index
    %c0_6 = arith.constant 0 : index
    %17 = vector.load %arg2[%c0_5, %c0_6] : memref<244x64xf32, #tpu.memory_space<vmem>>, vector<244x64xf32>
    %cst_7 = arith.constant dense<0.000000e+00> : vector<8x64xf32>
    %18 = tpu.matmul %16, %17, %cst_7 {dimension_numbers = #tpu.dot_dimension_numbers<[1], [0], [0], [1], [0, 0, 1, 1], [], []>} : vector<8x244xf32>, vector<244x64xf32>, vector<8x64xf32> -> vector<8x64xf32>
    %c0_8 = arith.constant 0 : index
    %c0_9 = arith.constant 0 : index
    %19 = vector.load %arg3[%c0_8, %c0_9] : memref<1x64xf32, #tpu.memory_space<vmem>>, vector<1x64xf32>
    %20 = vector.broadcast %19 : vector<1x64xf32> to vector<8x64xf32>
    %21 = arith.addf %18, %20 : vector<8x64xf32>
    %cst_10 = arith.constant 0.000000e+00 : f32
    %22 = vector.broadcast %cst_10 : f32 to vector<8x64xf32>
    %23 = arith.maximumf %21, %22 : vector<8x64xf32>
    %c0_11 = arith.constant 0 : index
    %c0_12 = arith.constant 0 : index
    %24 = vector.load %arg4[%c0_11, %c0_12] : memref<8x64xf32, #tpu.memory_space<vmem>>, vector<8x64xf32>
    tpu.vector_store %arg4[%c0_11, %c0_12], %23 {strides = array<i32>} : memref<8x64xf32, #tpu.memory_space<vmem>>, vector<8x64xf32>,
    return
  }
  func.func @transform_0(%arg0: i32) -> (i32, i32) {
    %c0_i32 = arith.constant 0 : i32
    %c0_i32_0 = arith.constant 0 : i32
    return %arg0, %c0_i32 : i32, i32
  }
  func.func @transform_1(%arg0: i32) -> (i32, i32) {
    %c0_i32 = arith.constant 0 : i32
    %c0_i32_0 = arith.constant 0 : i32
    %c0_i32_1 = arith.constant 0 : i32
    return %c0_i32, %c0_i32_0 : i32, i32
  }
  func.func @transform_2(%arg0: i32) -> (i32, i32) {
    %c0_i32 = arith.constant 0 : i32
    %c0_i32_0 = arith.constant 0 : i32
    %c0_i32_1 = arith.constant 0 : i32
    return %c0_i32, %c0_i32_0 : i32, i32
  }
  func.func @transform_3(%arg0: i32) -> (i32, i32) {
    %c0_i32 = arith.constant 0 : i32
    %c0_i32_0 = arith.constant 0 : i32
    return %arg0, %c0_i32 : i32, i32
  }
}

</mosaic_0001>

<bundles_post_ra>
// kernel: libs_feature_extractor.1
= control target key start
LH: loop header
LB: loop body
LE: loop exit
PB: predicated region body
PF: predicated region fallthrough
CT: control target
= control target key end

     0   :  { %vm17_vm0 = vcmask 949248   ;;  %s328_s0 = inlined_call_operand.vmem [shape: f32[8,244], index: 0, kind: input, shape index: {}]   ;;  %s329_s1 = inlined_call_operand.vmem [shape: f32[244,64], index: 1, kind: input, shape index: {}]   ;;  %s330_s2 = inlined_call_operand.vmem [shape: f32[1,64], index: 2, kind: input, shape index: {}]   ;;  %s331_s3 = inlined_call_operand.hbm [shape: f32[8,64], index: 3, kind: output, shape index: {}]  }
   0x1   :  { %v15_v0 = vld [vmem:[%s328_s0] sm:$0xff]  ;;  %v16_v1 = vld [vmem:[%s328_s0 + $0x8] sm:$0xff] }
   0x2   :  { %v18_v2 = vsel %vm17_vm0, %v16_v1, 0.0 }
   0x3   :  { %8 = vsyncpa [#allocation3], 0  ;;  %v19_v3 = vadd.f32 %v18_v2, %v15_v0  ;;  %v188_v4 = vmov 244.0   ;;  %v67_v5 = vld [vmem:[%s329_s1 + $0x78] sm:$0xff]  ;;  %v66_v6 = vld [vmem:[%s329_s1 + $0x70] sm:$0xff]  ;;  %vm90_vm1 = vcmask 1043456  }
   0x4   :  { %158 = vrcp.f32 %v188_v4  ;;  %v82_v7 = vld [vmem:[%s329_s1 + $0xf0] sm:$0xf]  ;;  %94 = vmatpush.msra.mxu0 %v67_v5  ;;  %v81_v9 = vld [vmem:[%s329_s1 + $0xe8] sm:$0xff]  ;;  %v80_v11 = vld [vmem:[%s329_s1 + $0xe0] sm:$0xff]  ;;  %s189_s22 = smov [#allocation2]   ;;  %s144_s26 = sshll.u32 %s331_s3, 4  ;;  %s145_s26 = int_to_ptr.hbm [resolvable:$true] %s144_s26 }
   0x5   :  { %20 = vadd.xlane.f32.xlu0 %v19_v3  ;;  %153 = vmatpush.msk.msra.mxu1 %vm90_vm1, %v82_v7  ;;  %v65_v10 = vld [vmem:[%s329_s1 + $0x68] sm:$0xff]  ;;  %v64_v13 = vld [vmem:[%s329_s1 + $0x60] sm:$0xff]  ;;  %v63_v26 = vld [vmem:[%s329_s1 + $0x58] sm:$0xff]  ;;  %s142_s23 = sshll.u32 %s189_s22, 4  ;;  %vm135_vm6 = vcmask 523264   ;;  %s143_s23 = int_to_ptr.vmem [resolvable:$true] %s142_s23 }
   0x6   :  { %95 = vmatpush.msra.mxu0 %v66_v6  ;;  %v79_v27 = vld [vmem:[%s329_s1 + $0xd8] sm:$0xff]  ;;  %v62_v28 = vld [vmem:[%s329_s1 + $0x50] sm:$0xff]  ;;  %v61_v30 = vld [vmem:[%s329_s1 + $0x48] sm:$0xff] }
   0x7   :  { %116 = vmatpush.msra.mxu1 %v81_v9  ;;  %v78_v29 = vld [vmem:[%s329_s1 + $0xd0] sm:$0xff]  ;;  %v77_v31 = vld [vmem:[%s329_s1 + $0xc8] sm:$0xff]  ;;  %v60_v32 = vld [vmem:[%s329_s1 + $0x40] sm:$0xff] }
   0x8   :  { %96 = vmatpush.msra.mxu0 %v65_v10  ;;  %v76_v33 = vld [vmem:[%s329_s1 + $0xc0] sm:$0xff]  ;;  %v59_v34 = vld [vmem:[%s329_s1 + $0x38] sm:$0xff]  ;;  %v58_v36 = vld [vmem:[%s329_s1 + $0x30] sm:$0xff] }
   0x9   :  { %117 = vmatpush.msra.mxu1 %v80_v11  ;;  %v75_v35 = vld [vmem:[%s329_s1 + $0xb8] sm:$0xff]  ;;  %v74_v37 = vld [vmem:[%s329_s1 + $0xb0] sm:$0xff]  ;;  %v57_v38 = vld [vmem:[%s329_s1 + $0x28] sm:$0xff] }
   0xa   :  { %v159_v8 = vpop.eup %158  ;;  %97 = vmatpush.msra.mxu0 %v64_v13  ;;  %v73_v39 = vld [vmem:[%s329_s1 + $0xa8] sm:$0xff]  ;;  %v56_v40 = vld [vmem:[%s329_s1 + $0x20] sm:$0xff]  ;;  %v55_v42 = vld [vmem:[%s329_s1 + $0x18] sm:$0xff] }
   0xb   :  { %v23_v12 = vmul.f32 244.0, %v159_v8  ;;  %vm27_vm2 = vweird.f32 %v159_v8  ;;  %118 = vmatpush.msra.mxu1 %v79_v27  ;;  %v72_v41 = vld [vmem:[%s329_s1 + $0xa0] sm:$0xff]  ;;  %v71_v43 = vld [vmem:[%s329_s1 + $0x98] sm:$0xff]  ;;  %v54_v44 = vld [vmem:[%s329_s1 + $0x10] sm:$0xff] }
   0xc   :  { %98 = vmatpush.msra.mxu0 %v63_v26  ;;  %v70_v45 = vld [vmem:[%s329_s1 + $0x90] sm:$0xff]  ;;  %v53_v46 = vld [vmem:[%s329_s1 + $0x8] sm:$0xff]  ;;  %v52_v48 = vld [vmem:[%s329_s1] sm:$0xff] }
   0xd   :  { %v24_v14 = vsub.f32 1.0, %v23_v12  ;;  %119 = vmatpush.msra.mxu1 %v78_v29  ;;  %v69_v47 = vld [vmem:[%s329_s1 + $0x88] sm:$0xff]  ;;  %v68_v49 = vld [vmem:[%s329_s1 + $0x80] sm:$0xff] }
   0xe   :  { %99 = vmatpush.msra.mxu0 %v62_v28  ;;  %v157_v62 = vld [vmem:[%s330_s2] ss:$0 sm:$0xff] }
   0xf   :  { %v25_v15 = vmul.f32 %v159_v8, %v24_v14  ;;  %120 = vmatpush.msra.mxu1 %v77_v31 }
  0x10   :  { %100 = vmatpush.msra.mxu0 %v61_v30 }
  0x11   :  { %v26_v16 = vadd.f32 %v159_v8, %v25_v15  ;;  %121 = vmatpush.msra.mxu1 %v76_v33 }
  0x12   :  { %101 = vmatpush.msra.mxu0 %v60_v32 }
  0x13   :  { %v28_v17 = vsel %vm27_vm2, %v159_v8, %v26_v16  ;;  %122 = vmatpush.msra.mxu1 %v75_v35 }
  0x14   :  { %102 = vmatpush.msra.mxu0 %v59_v34 }
  0x15   :  { %123 = vmatpush.msra.mxu1 %v74_v37 }
  0x16   :  { %103 = vmatpush.msra.mxu0 %v58_v36 }
  0x17   :  { %124 = vmatpush.msra.mxu1 %v73_v39 }
  0x18   :  { %104 = vmatpush.msra.mxu0 %v57_v38 }
  0x19   :  { %125 = vmatpush.msra.mxu1 %v72_v41 }
  0x1a   :  { %105 = vmatpush.msra.mxu0 %v56_v40 }
  0x1b   :  { %126 = vmatpush.msra.mxu1 %v71_v43 }
  0x1c   :  { %106 = vmatpush.msra.mxu0 %v55_v42 }
  0x1d   :  { %127 = vmatpush.msra.mxu1 %v70_v45 }
  0x1e   :  { %107 = vmatpush.msra.mxu0 %v54_v44 }
  0x1f   :  { %128 = vmatpush.msra.mxu1 %v69_v47 }
  0x20   :  { %108 = vmatpush.msra.mxu0 %v53_v46 }
  0x21   :  { %129 = vmatpush.msra.mxu1 %v68_v49 }
  0x22   :  { %109 = vmatpush.msra.mxu0 %v52_v48 }
  0x78   :  { %v21_v18 = vpop.xlane.xlu0 %20 }
  0x79   :  { %v29_v19 = vmul.f32 %v28_v17, %v21_v18 }
  0x7b   :  { %v238_v20 = vsub.f32 %v15_v0, %v29_v19  ;;  %v240_v21 = vsub.f32 %v16_v1, %v29_v19 }
  0x7d   :  { %v32_v22 = vmul.f32 %v238_v20, %v238_v20  ;;  %v33_v23 = vmul.f32 %v240_v21, %v240_v21 }
  0x7f   :  { %v34_v24 = vsel %vm17_vm0, %v33_v23, 0.0 }
  0x80   :  { %v35_v25 = vadd.f32 %v34_v24, %v32_v22 }
  0x82   :  { %36 = vadd.xlane.f32.xlu0 %v35_v25 }
  0xf5   :  { %v37_v50 = vpop.xlane.xlu0 %36 }
  0xf6   :  { %v38_v51 = vmul.f32 %v37_v50, %v28_v17 }
  0xf8   :  { %v39_v52 = vadd.f32 1e-05, %v38_v51 }
  0xfa   :  { %160 = vrsqrt.f32 %v39_v52  ;;  %vm46_vm4 = vweird.f32 %v39_v52 }
 0x100   :  { %v161_v53 = vpop.eup %160 }
 0x101   :  { %v41_v54 = vmul.f32 %v161_v53, %v39_v52  ;;  %vm47_vm3 = vweird.f32 %v161_v53 }
 0x102   :  { %vm48_vm5 = vmor %vm46_vm4, %vm47_vm3 }
 0x103   :  { %v42_v55 = vmul.f32 %v161_v53, %v41_v54 }
 0x105   :  { %v43_v56 = vmul.f32 0.5, %v42_v55 }
 0x107   :  { %v44_v57 = vsub.f32 1.5, %v43_v56 }
 0x109   :  { %v45_v58 = vmul.f32 %v161_v53, %v44_v57 }
 0x10b   :  { %v49_v59 = vsel %vm48_vm5, %v161_v53, %v45_v58 }
 0x10c   :  { %v50_v60 = vmul.f32 %v49_v59, %v238_v20  ;;  %v51_v61 = vmul.f32 %v49_v59, %v240_v21 }
 0x10e   :  { %110 = vmatmul.f32.vlgmr.msra.gmra.mxu0 %v50_v60  ;;  %154 = vmatmul.msk.f32.vlgmr.msra.gmra.mxu1 %vm17_vm0, %v51_v61 }
 0x18b   :  { %v111_v63 = vpop.f32.mrf.mxu0  ;;  %v131_v1 = vpop.f32.mrf.mxu1 }
 0x18c   :  { %v112_v0 = vadd.f32 %v157_v62, %v111_v63 }
 0x18e   :  { %v132_v2 = vadd.f32 %v131_v1, %v112_v0 }
 0x190   :  { %v134_v3 = vmax.f32 %v132_v2, 0.0 }
 0x192   :  { %136 = vst.msk [vmem:[#allocation2] sm:$0xff] %vm135_vm6, %v134_v3 }
 0x193   :  { %147 = dma.vmem_to_hbm [thread:$0]  %s143_s23, 128, %s145_s26, [#allocation3]  }
 0x194   :  { %186 = dma.done.wait [#allocation3], 128  }
 0x195   :  { %187 = vsyncadd [#allocation3], 4294967168 }
 0x196   :  { %152 = vsyncpa [#allocation3], 1 }

</bundles_post_ra>
